<compile_context>
chip_gen: v7x
topology: tpu7x:2x2x1
jax: 0.10.0
libtpu: 0.0.40
codegen_flags: <defaults>
</compile_context>

<pallas_src>
import jax
import jax.numpy as jnp
import numpy as np
from jax.experimental import pallas as pl
from jax.experimental.pallas import tpu as pltpu


def pa_kernel(x_ref, w_ref, b_ref, o_ref):
    # x_ref: (Bt, C, T)   input tile  (C on sublanes, spatial on lanes)
    # w_ref: (C, C)       1x1 conv weight
    # b_ref: (C, 1)       1x1 conv bias
    # o_ref: (Bt, C, T)
    w = w_ref[...]
    b = b_ref[...]
    for i in range(x_ref.shape[0]):          # static unroll over the batch block
        x = x_ref[i]                          # (C, T)
        y = jnp.dot(w, x, preferred_element_type=jnp.float32) + b
        # Explicit sigmoid: exp + divide both route to the EUP slot.
        s = pl.reciprocal(1.0 + jnp.exp(-y), approx=True)
        o_ref[i] = (x * s).astype(o_ref.dtype)


def _pick_spatial_tile(hw, cap):
    """Largest lane-dense spatial tile <= cap that avoids any HBM pad/slice."""
    cap = max(128, (cap // 128) * 128)
    if hw <= cap:
        return hw, False                      # full spatial extent (no pad needed)
    t = cap
    while t >= 128:
        if hw % t == 0:
            return t, False                   # 128-multiple divisor of hw
        t -= 128
    return cap, True                          # rare fallback: pad + slice


def pa_pallas(x_nchw, w, b, *, tile_hw=16384):
    """PA forward: out = x * sigmoid(conv1x1(x) + b).

    x_nchw: (N, C, H, W) float32
    w:      (C_out, C_in)  (= PyTorch conv weight[:, :, 0, 0])
    b:      (C_out,)
    """
    N, C, H, W = x_nchw.shape
    hw = H * W
    x = x_nchw.reshape(N, C, hw).astype(jnp.float32)   # free reshape, no transpose

    t, needs_pad = _pick_spatial_tile(hw, tile_hw)
    hw_pad = hw
    if needs_pad:
        # TODO(synk): rare path (hw > tile_hw with no 128-multiple divisor);
        # this costs two extra HBM passes (pad + slice).
        hw_pad = ((hw + t - 1) // t) * t
        x = jnp.pad(x, ((0, 0), (0, 0), (0, hw_pad - hw)))

    spatial_blocks = hw_pad // t
    # Keep >= 2 total grid steps so both v7x TensorCores get work.
    if N * spatial_blocks < 2 and t % 256 == 0:
        t //= 2
        spatial_blocks = hw_pad // t

    # Fold batch elements per step when images are small, so each grid step
    # carries enough bytes to amortize the ~0.35 us per-step overhead.
    bt = 1
    while (N % (2 * bt) == 0
           and 2 * bt * C * t * 4 <= (8 << 20)          # keep buffers modest
           and bt * C * t * 4 < (1 << 20)                # grow until ~1 MiB/step
           and (N // (2 * bt)) * spatial_blocks >= 2):   # keep >= 2 grid steps
        bt *= 2

    grid = (N // bt, spatial_blocks)
    w2 = w.astype(jnp.float32)
    b2 = b.reshape(C, 1).astype(jnp.float32)

    # Double-buffered in+out tiles plus elementwise intermediates + slack.
    per_buf = bt * C * t * 4
    vmem_limit = int(min(60 << 20, max(32 << 20, 8 * per_buf + (4 << 20))))

    cost = pl.CostEstimate(
        flops=2 * N * hw_pad * C * C + 2 * N * hw_pad * C,
        transcendentals=N * hw_pad * C,
        bytes_accessed=(2 * N * C * hw_pad + C * C + C) * 4,
    )

    out = pl.pallas_call(
        pa_kernel,
        out_shape=jax.ShapeDtypeStruct((N, C, hw_pad), jnp.float32),
        grid_spec=pltpu.PrefetchScalarGridSpec(
            num_scalar_prefetch=0,
            grid=grid,
            in_specs=[
                pl.BlockSpec((bt, C, t), lambda n, s: (n, 0, s)),
                pl.BlockSpec((C, C), lambda n, s: (0, 0)),
                pl.BlockSpec((C, 1), lambda n, s: (0, 0)),
            ],
            out_specs=pl.BlockSpec((bt, C, t), lambda n, s: (n, 0, s)),
        ),
        compiler_params=pltpu.CompilerParams(
            dimension_semantics=("parallel", "parallel"),
            vmem_limit_bytes=vmem_limit),
        cost_estimate=cost,
    )(x, w2, b2)

    if needs_pad:
        out = out[:, :, :hw]
    return out.reshape(N, C, H, W)


def pa_reference(x_nchw, w, b):
    """Pure-JAX reference for validation."""
    xf = x_nchw.astype(jnp.float32)
    y = jnp.einsum("oc,nchw->nohw", w, xf) + b[None, :, None, None]
    return xf * jax.nn.sigmoid(y)


if __name__ == "__main__":
    # Small deterministic problem: N=2, nf=8, H=W=16 (PyTorch conv input NCHW).
    N, nf, H, W = 2, 8, 16, 16
    key = jax.random.PRNGKey(0)
    kx, kw, kb = jax.random.split(key, 3)

    x = jax.random.normal(kx, (N, nf, H, W), jnp.float32)
    conv_weight = 0.1 * jax.random.normal(kw, (nf, nf, 1, 1), jnp.float32)   # (O, I, 1, 1)
    conv_bias = 0.1 * jax.random.normal(kb, (nf,), jnp.float32)

    w = conv_weight[:, :, 0, 0]                                  # (C_out, C_in)
    b = conv_bias

    out = jax.block_until_ready(pa_pallas(x, w, b))
    ref = jax.block_until_ready(pa_reference(x, w, b))

    assert out.shape == (N, nf, H, W)
    # Tolerance loosened slightly for the approx-reciprocal sigmoid.
    np.testing.assert_allclose(np.asarray(out), np.asarray(ref),
                               rtol=5e-3, atol=1e-3)
    print("KERNEL_OK")
</pallas_src>

<mosaic_0001>
module attributes {stable_mosaic.version = 11 : i64} {
  func.func @pa_kernel(%arg0: i32, %arg1: i32, %arg2: memref<1x8x256xf32, #tpu.memory_space<vmem>>, %arg3: memref<8x8xf32, #tpu.memory_space<vmem>>, %arg4: memref<8x1xf32, #tpu.memory_space<vmem>>, %arg5: memref<1x8x256xf32, #tpu.memory_space<vmem>>) attributes {dimension_semantics = [#tpu.dimension_semantics<parallel>, #tpu.dimension_semantics<parallel>], iteration_bounds = array<i64: 2, 1>, scalar_prefetch = 0 : i64, scratch_operands = 0 : i64, tpu.core_type = #tpu.core_type<tc>, window_params = [{transform_indices = @transform_0, window_bounds = array<i64: 1, 8, 256>}, {pipeline_mode = #tpu.pipeline_mode<synchronous>, transform_indices = @transform_1, window_bounds = array<i64: 8, 8>}, {pipeline_mode = #tpu.pipeline_mode<synchronous>, transform_indices = @transform_2, window_bounds = array<i64: 8, 1>}, {transform_indices = @transform_3, window_bounds = array<i64: 1, 8, 256>}]} {
    %c0 = arith.constant 0 : index
    %c0_0 = arith.constant 0 : index
    %0 = vector.load %arg3[%c0, %c0_0] : memref<8x8xf32, #tpu.memory_space<vmem>>, vector<8x8xf32>
    %c0_1 = arith.constant 0 : index
    %c0_2 = arith.constant 0 : index
    %1 = vector.load %arg4[%c0_1, %c0_2] : memref<8x1xf32, #tpu.memory_space<vmem>>, vector<8x1xf32>
    %c0_3 = arith.constant 0 : index
    %c0_4 = arith.constant 0 : index
    %c0_5 = arith.constant 0 : index
    %2 = vector.load %arg2[%c0_3, %c0_4, %c0_5] : memref<1x8x256xf32, #tpu.memory_space<vmem>>, vector<1x8x256xf32>
    %3 = vector.shape_cast %2 : vector<1x8x256xf32> to vector<8x256xf32>
    %cst = arith.constant dense<0.000000e+00> : vector<8x256xf32>
    %4 = tpu.matmul %0, %3, %cst {dimension_numbers = #tpu.dot_dimension_numbers<[1], [0], [0], [1], [0, 0, 1, 1], [], []>} : vector<8x8xf32>, vector<8x256xf32>, vector<8x256xf32> -> vector<8x256xf32>
    %5 = vector.broadcast %1 : vector<8x1xf32> to vector<8x256xf32>
    %6 = arith.addf %4, %5 : vector<8x256xf32>
    %cst_6 = arith.constant 0.000000e+00 : f32
    %7 = vector.broadcast %cst_6 : f32 to vector<8x256xf32>
    %8 = arith.subf %7, %6 : vector<8x256xf32>
    %9 = math.exp %8 : vector<8x256xf32>
    %cst_7 = arith.constant 1.000000e+00 : f32
    %10 = vector.broadcast %cst_7 : f32 to vector<8x256xf32>
    %11 = arith.addf %10, %9 : vector<8x256xf32>
    %12 = tpu.reciprocal %11 {approx = true} : vector<8x256xf32> -> vector<8x256xf32>
    %13 = arith.mulf %3, %12 : vector<8x256xf32>
    %c0_8 = arith.constant 0 : index
    %c0_9 = arith.constant 0 : index
    %c0_10 = arith.constant 0 : index
    %14 = vector.load %arg5[%c0_8, %c0_9, %c0_10] : memref<1x8x256xf32, #tpu.memory_space<vmem>>, vector<1x8x256xf32>
    %15 = vector.shape_cast %14 : vector<1x8x256xf32> to vector<8x256xf32>
    %16 = vector.shape_cast %13 : vector<8x256xf32> to vector<1x8x256xf32>
    tpu.vector_store %arg5[%c0_8, %c0_9, %c0_10], %16 {strides = array<i32>} : memref<1x8x256xf32, #tpu.memory_space<vmem>>, vector<1x8x256xf32>,
    return
  }
  func.func @transform_0(%arg0: i32, %arg1: i32) -> (i32, i32, i32) {
    %c0_i32 = arith.constant 0 : i32
    %c0_i32_0 = arith.constant 0 : i32
    return %arg0, %c0_i32, %arg1 : i32, i32, i32
  }
  func.func @transform_1(%arg0: i32, %arg1: i32) -> (i32, i32) {
    %c0_i32 = arith.constant 0 : i32
    %c0_i32_0 = arith.constant 0 : i32
    %c0_i32_1 = arith.constant 0 : i32
    return %c0_i32, %c0_i32_0 : i32, i32
  }
  func.func @transform_2(%arg0: i32, %arg1: i32) -> (i32, i32) {
    %c0_i32 = arith.constant 0 : i32
    %c0_i32_0 = arith.constant 0 : i32
    %c0_i32_1 = arith.constant 0 : i32
    return %c0_i32, %c0_i32_0 : i32, i32
  }
  func.func @transform_3(%arg0: i32, %arg1: i32) -> (i32, i32, i32) {
    %c0_i32 = arith.constant 0 : i32
    %c0_i32_0 = arith.constant 0 : i32
    return %arg0, %c0_i32, %arg1 : i32, i32, i32
  }
}

</mosaic_0001>

<bundles_post_ra>
// kernel: tpu_custom_call.1
= control target key start
LH: loop header
LB: loop body
LE: loop exit
PB: predicated region body
PF: predicated region fallthrough
CT: control target
= control target key end

     0   :  { %8 = vsyncpa [#allocation3], 0  ;;  %s817_s0 = inlined_call_operand.hbm [shape: f32[2,8,256], index: 0, kind: input, shape index: {}]   ;;  %s818_s1 = inlined_call_operand.vmem [shape: f32[8,8], index: 1, kind: input, shape index: {}]   ;;  %s819_s2 = inlined_call_operand.vmem [shape: f32[8,1], index: 2, kind: input, shape index: {}]   ;;  %s820_s3 = inlined_call_operand.hbm [shape: f32[2,8,256], index: 3, kind: output, shape index: {}]  }
   0x1   :  { %10 = vsyncpa [#allocation3 + $0x1], 0 }
   0x2   :  { %11 = vsyncpa [#allocation4], 0 }
   0x3   :  { %13 = vsyncpa [#allocation4 + $0x1], 0  ;;  %s635_s12 = smov 0   ;;  %s637_s13 = smov 0  }
   0x4   :  { %s639_s14 = smov 0   ;;  %s641_s15 = smov 0  }
   0x5   :  { %s643_s16 = smov 0   ;;  %s645_s17 = smov 0  }
   0x6 LB: > { %s406_s18 = sadd.s32 4294967295, %s609_s17   ;;  %s407_s19 = sadd.s32 4294967294, %s609_s17   ;;  %s609_s17 = sphi %s645_s17, %s19_s17   ;;  %s605_s16 = sphi %s643_s16, %s836_s16   ;;  %s601_s15 = sphi %s641_s15, %s835_s15   ;;  %s597_s14 = sphi %s639_s14, %s834_s14   ;;  %s593_s13 = sphi %s637_s13, %s833_s13   ;;  %s589_s12 = sphi %s635_s12, %s832_s12  }
   0x7   : > { %s31_s20 = sadd.s32 1, %s605_s16  ;;  %s40_s21 = sadd.s32 1, %s597_s14 }
   0x8   : > { %p33_p0 = scmp.ge.s32.totalorder %s31_s20, 2  ;;  %p47_p1 = scmp.ne.s32.totalorder %s597_s14, %s593_s13 }
   0x9   : > { %p48_p2 = scmp.eq.s32.totalorder %s609_s17, 0  ;;  %p53_p3 = scmp.ne.s32.totalorder %s593_s13, %s589_s12 }
   0xa   : > { %s838_s20 = smov (%p33_p0, %s31_s20), 0  ;;  %p54_p5 = scmp.eq.s32.totalorder %s406_s18, 0 }
   0xb   : > { %p676_p4 = por %p48_p2, %p47_p1  ;;  %s35_s23 = ssub.s32 %s605_s16, %s838_s20 }
   0xc   : > { %p121_p6 = scmp.eq.s32.totalorder %s406_s18, 1  ;;  %p38_p7 = scmp.eq.s32.totalorder %s35_s23, 0 }
   0xd   : > { %p682_p8 = por %p54_p5, %p53_p3  ;;  %p127_p10 = scmp.eq.s32.totalorder %s407_s19, 1 }
   0xe   : > { %p686_p9 = por %p121_p6, %p47_p1  ;;  %p436_p13 = scmp.lt.s32.totalorder %s609_s17, 2 }
   0xf   : > { %s691_s26 = scalar_select %p38_p7, %s597_s14, %s40_s21  }
  0x10   : > { %s824_s25 = scalar_select %p686_p9, 1, 0 }
  0x11   : > { %p693_p11 = por %p127_p10, %p53_p3  ;;  %s153_s28 = sand.u32 1, %s597_s14  }
  0x12   : > { %s410_s29 = sshll.u32 %s153_s28, 4  ;;  %s422_s30 = sshll.u32 %s605_s16, 8 }
  0x13   : > { %s825_s27 = scalar_select %p693_p11, 1, 0 }
  0x14   : > { %s704_s6 = scalar_lea.hbm %s817_s0, %s422_s30  ;;  %s157_s7 = scalar_lea.vmem [#allocation2], %s410_s29 }
  0x15   : > { %s167_s8 = sshll.u32 %s157_s7, 4  ;;  %p710_p0 = pnand %p436_p13, %p676_p4  ;;  %s706_s8 = int_to_ptr.vmem [resolvable:$true] %s167_s8 }
  0x16   : > { %s154_s10 = scalar_lea.sflag [#allocation3], %s153_s28  ;;  %s497_s11 = scalar_lea.hbm %s704_s6, 256 }
  0x17   : > { %p498_p3 = scmp.ne.s32.totalorder %s704_s6, %s497_s11  ;;  %p499_p5 = pneg %p710_p0 }
  0x18   : > { %s502_s21 = scalar_lea.hbm %s817_s0, 512  ;;  %p503_p4 = scmp.lt.u32.totalorder %s704_s6, %s817_s0 }
  0x19   : > { %p500_p6 = pnand %p499_p5, %p498_p3  ;;  %p504_p10 = scmp.lt.u32.totalorder %s502_s21, %s497_s11 }
  0x1a   : > { %p506_p12 = scmp.lt.u32.totalorder %s497_s11, %s704_s6 }
  0x1b   : > { %p501_p7 = pneg %p500_p6  ;;  %p505_p13 = por %p504_p10, %p503_p4 }
  0x1d   : > { %p507_p1 = por %p506_p12, %p505_p13 }
  0x1f   : > { %p508_p2 = pnand %p507_p1, %p501_p7 }
  0x21   : > { %511 = shalt.err (!%p508_p2)
}
  0x22   : > { %s512_s28 = scalar_lea.vmem %s706_s8, 256  ;;  %s611_s29 = smov [#allocation2]  }
  0x23   : > { %p513_p3 = scmp.ne.s32.totalorder %s706_s8, %s512_s28  ;;  %s517_s30 = sshll.u32 %s611_s29, 4  ;;  %s518_s30 = int_to_ptr.vmem [resolvable:$false] %s517_s30 }
  0x24   : > { %s519_s4 = scalar_lea.vmem %s518_s30, 512  ;;  %p520_p9 = scmp.lt.s32.totalorder %s706_s8, %s518_s30 }
  0x25   : > { %p515_p6 = pnand %p513_p3, %p499_p5  ;;  %p521_p4 = scmp.lt.s32.totalorder %s519_s4, %s512_s28 }
  0x27   : > { %p516_p11 = pneg %p515_p6  ;;  %p522_p10 = por %p521_p4, %p520_p9 }
  0x29   : > { %p523_p12 = pnand %p522_p10, %p516_p11 }
  0x2b   : > { %526 = shalt.err (!%p523_p12)
}
  0x2c   : > { %431 = dma.hbm_to_vmem [thread:$0]  (!%p710_p0), %s704_s6, 256, %s706_s8, %s154_s10  }
  0x2d   : > { %p827_p1 = scmp.lt.s32.totalorder %s609_s17, 3  ;;  %p828_p2 = scmp.ge.s32.totalorder %s609_s17, 1 }
  0x2f   : > { %p173_p5 = pnand %p828_p2, %p827_p1 }
  0x30   : > { %s746_s5 = sand.u32 (!%p173_p5), 1, %s593_s13  }
  0x31   : > { %176 = sbr.rel (%p173_p5) target bundleno = 320 (0x140), region = 32  ;;  %s414_s7 = sshll.u32 (!%p173_p5), %s746_s5, 4 }
  0x32   : > { %s179_s11 = scalar_lea.sflag (!%p173_p5), [#allocation3], %s746_s5  ;;  %s182_s9 = scalar_lea.vmem (!%p173_p5), [#allocation2], %s414_s7 }
  0x38   : > { %580 = dma.done.wait (%p682_p8), %s179_s11, 256  }
  0x39   : > { %582 = vsyncadd (%p682_p8), %s179_s11, 4294967040  ;;  %v612_v0 = vmov 0.0   ;;  %v613_v1 = vmov 0   ;;  %v210_v2 = vld [vmem:[%s182_s9 + $0x8] sm:$0xff]  ;;  %v209_v3 = vld [vmem:[%s182_s9] sm:$0xff]  ;;  %vm216_vm0 = vcmask 64512  }
  0x3a   : > { %284 = vmatprep.mubr.f32.mxu0 %v612_v0  ;;  %488 = vset.pattern.permute.xlu0 %v613_v1  ;;  %v207_v4 = vld [vmem:[%s818_s1] sm:$0xff]  ;;  %s423_s24 = sshll.u32 %s601_s15, 8  ;;  %s204_s19 = scalar_lea.vmem [#allocation5], %s414_s7 }
  0x3b   : > { %220 = vmatprep.subr.mxu0 %v210_v2  ;;  %v208_v5 = vld [vmem:[%s819_s2] sm:$0xff]  ;;  %s322_s21 = sshll.u32 %s204_s19, 4  ;;  %s768_s28 = scalar_lea.hbm %s820_s3, %s423_s24  ;;  %s770_s21 = int_to_ptr.vmem [resolvable:$true] %s322_s21 }
  0x3c   : > { %221 = vmatpush1.msra.mxu0 %v209_v3  ;;  %213 = vperm.xlu0 %488, %v208_v5   ;;  %s306_s15 = scalar_lea.sflag [#allocation4], %s746_s5  ;;  %s527_s29 = scalar_lea.vmem %s770_s21, 256 }
  0x3d   : > { %416 = vmatmul.mubr.msk.f32.vlgmr.msra.gmra.mrb[0].mxu0 %vm216_vm0, %v207_v4  ;;  %p528_p8 = scmp.ne.s32.totalorder %s770_s21, %s527_s29  ;;  %p829_p9 = scmp.ne.s32.totalorder %s824_s25, 0 }
  0x3e   : > { %s614_s30 = smov [#allocation5]  }
  0x3f   : > { %p529_p11 = pnand %p528_p8, %p829_p9  ;;  %s531_s4 = sshll.u32 %s614_s30, 4  ;;  %s532_s4 = int_to_ptr.vmem [resolvable:$false] %s531_s4 }
  0x40   : > { %s533_s7 = scalar_lea.vmem %s532_s4, 512  ;;  %p534_p7 = scmp.lt.s32.totalorder %s770_s21, %s532_s4 }
  0x41   : > { %p530_p0 = pneg %p529_p11  ;;  %p535_p13 = scmp.lt.s32.totalorder %s533_s7, %s527_s29 }
  0x43   : > { %p536_p3 = por %p535_p13, %p534_p7 }
  0x45   : > { %p537_p6 = pnand %p536_p3, %p530_p0 }
  0xbb   : > { %v214_v6 = vpop.permute.xlu0 %213 }
 0x110   : > { %v286_v7 = vpop.f32.mrb[0].mxu0 }
 0x111   : > { %v287_v8 = vadd.f32 %v286_v7, %v214_v6  ;;  %v288_v9 = vpop.f32.mrb[1].mxu0 }
 0x112   : > { %v289_v10 = vadd.f32 %v288_v9, %v214_v6 }
 0x113   : > { %v291_v11 = vsub.f32 0.0, %v287_v8 }
 0x114   : > { %v292_v12 = vsub.f32 0.0, %v289_v10 }
 0x115   : > { %v293_v13 = vmul.f32 1.442695, %v291_v11 }
 0x116   : > { %v295_v14 = vmul.f32 1.442695, %v292_v12 }
 0x117   : > { %489 = vpow2.f32 %v293_v13 }
 0x118   : > { %491 = vpow2.f32 %v295_v14 }
 0x121   : > { %v490_v15 = vpop.eup %489 }
 0x122   : > { %v492_v16 = vpop.eup %491  ;;  %v297_v17 = vadd.f32 1.0, %v490_v15 }
 0x123   : > { %v298_v18 = vadd.f32 1.0, %v492_v16 }
 0x124   : > { %493 = vrcp.f32 %v297_v17 }
 0x125   : > { %495 = vrcp.f32 %v298_v18 }
 0x12e   : > { %v494_v19 = vpop.eup %493 }
 0x12f   : > { %v496_v20 = vpop.eup %495  ;;  %v301_v21 = vmul.f32 %v494_v19, %v209_v3 }
 0x130   : > { %v302_v22 = vmul.f32 %v496_v20, %v210_v2 }
 0x131   : > { %303 = vst [vmem:[%s204_s19] sm:$0xff] %v301_v21 }
 0x132   : > { %304 = vst [vmem:[%s204_s19 + $0x8] sm:$0xff] %v302_v22 }
 0x133   : > { %540 = shalt.err (!%p537_p6)
}
 0x134   : > { %s541_s5 = scalar_lea.hbm %s768_s28, 256  ;;  %s545_s6 = scalar_lea.hbm %s820_s3, 512 }
 0x135   : > { %p542_p4 = scmp.ne.s32.totalorder %s768_s28, %s541_s5  ;;  %p546_p1 = scmp.lt.u32.totalorder %s768_s28, %s820_s3 }
 0x136   : > { %p547_p2 = scmp.lt.u32.totalorder %s545_s6, %s541_s5  ;;  %p549_p8 = scmp.lt.u32.totalorder %s541_s5, %s768_s28 }
 0x137   : > { %p543_p10 = pnand %p542_p4, %p829_p9 }
 0x138   : > { %p548_p5 = por %p547_p2, %p546_p1 }
 0x139   : > { %p544_p12 = pneg %p543_p10 }
 0x13a   : > { %p550_p11 = por %p549_p8, %p548_p5 }
 0x13c   : > { %p551_p0 = pnand %p550_p11, %p544_p12 }
 0x13e   : > { %554 = shalt.err (!%p551_p0)
}
 0x13f   : > { %426 = dma.vmem_to_hbm [thread:$0]  (%p829_p9), %s770_s21, 256, %s768_s28, %s306_s15  }
 0x140 PF: > { %s334_s18 = sand.u32 1, %s589_s12   ;;  %p830_p7 = scmp.ne.s32.totalorder %s825_s27, 0 }
 0x141   : > { %p831_p13 = scmp.ge.s32.totalorder %s609_s17, 2  ;;  %s335_s24 = scalar_lea.sflag [#allocation4], %s334_s18 }
 0x143   : > { %p433_p3 = pnand %p831_p13, %p830_p7 }
 0x145   : > { %584 = dma.done.wait (!%p433_p3), %s335_s24, 256  }
 0x146   : > { %586 = vsyncadd (!%p433_p3), %s335_s24, 4294967040  ;;  %s19_s17 = sadd.s32 1, %s609_s17   ;;  %s832_s12 = smov %s593_s13 }
 0x147   : > { %p16_p6 = scmp.ge.s32.totalorder %s19_s17, 4   ;;  %s833_s13 = smov %s597_s14 }
 0x148   : > { %s834_s14 = smov %s691_s26  ;;  %s835_s15 = smov %s605_s16 }
 0x149   : > { %s836_s16 = smov %s838_s20  ;;  %18 = sbr.rel (!%p16_p6) target bundleno = 6 (0x6), region = 77 }
 0x150   :  { %340 = vsyncpa [#allocation3], 1 }
 0x151   :  { %342 = vsyncpa [#allocation3 + $0x1], 1 }
 0x152   :  { %343 = vsyncpa [#allocation4], 1 }
 0x153   :  { %345 = vsyncpa [#allocation4 + $0x1], 1 }

</bundles_post_ra>
